<compile_context>
chip_gen: v5e
topology: v5e:2x2
jax: 0.10.0
libtpu: 0.0.40
codegen_flags: <defaults>
</compile_context>

<pallas_src>
import functools

import jax
import jax.numpy as jnp
from jax.experimental import pallas as pl
from jax.experimental.pallas import tpu as pltpu


# ------------------------------ fused kernel --------------------------------


def _fused_encoder_kernel(x_ref, w1_ref, b1_ref, w2_ref, b2_ref, w3_ref, b3_ref,
                          wr3_ref, wr1_ref, o_ref, e_scr, o_scr, k3_scr,
                          *, batch, l_out, cin, n_res, pack_rows):
    """Fused IMUEncoder forward on channels-last slabs (batch folded into M).

    x_ref  : (B, l_out+2, 4*cin) NLC input packed 4 timesteps per row with one
             zero halo row at each end: x_ref[b, u+1, r*cin:(r+1)*cin] = x[b, 4u+r].
    e_scr  : (B, l_out+1, h2) conv_1 odd-position rows (+ leading zero halo).
    o_scr  : (B, l_out+1, h2) conv_1 even-position rows (+ trailing zero halo).
    k3_scr : (B, l_out+2, hid) zero-halo staging for the k=3 convolutions.
    o_ref  : (pack_rows, M/pack_rows*hid) lane-dense output (or (M, hid)).
    """
    h2 = w1_ref.shape[1]
    hid = w2_ref.shape[1]
    c = cin
    l = l_out
    m = batch * l_out

    # --- conv_1 (k=4, s=2, pad=1) + ReLU: ONE im2col dot for even+odd rows ---
    # Taps are x_pad[4u + r] (even outputs t=2u) and x_pad[4u + 2 + r] (odd
    # outputs t=2u+1), r=0..3; with the 4-per-row packing + halo they are all
    # static ref views (no strided access, no value-level zero-row shifts).
    x1e = jnp.concatenate(
        [x_ref[:, 0:l, 3 * c:4 * c],        # x_pad[4u + 0]
         x_ref[:, 1:l + 1, 0:c],            # x_pad[4u + 1]
         x_ref[:, 1:l + 1, c:2 * c],        # x_pad[4u + 2]
         x_ref[:, 1:l + 1, 2 * c:3 * c]],   # x_pad[4u + 3]
        axis=-1).reshape(m, 4 * c)
    x1o = jnp.concatenate(
        [x_ref[:, 1:l + 1, c:2 * c],        # x_pad[4u + 2]
         x_ref[:, 1:l + 1, 2 * c:3 * c],    # x_pad[4u + 3]
         x_ref[:, 1:l + 1, 3 * c:4 * c],    # x_pad[4u + 4]
         x_ref[:, 2:l + 2, 0:c]],           # x_pad[4u + 5]
        axis=-1).reshape(m, 4 * c)
    y1 = jnp.maximum(
        jnp.dot(jnp.concatenate([x1e, x1o], axis=0), w1_ref[...],
                preferred_element_type=jnp.float32) + b1_ref[...], 0.0)
    y1e = y1[0:m, :]        # conv_1 output at even positions t = 2u
    y1o = y1[m:2 * m, :]    # conv_1 output at odd positions  t = 2u + 1

    # --- conv_2 (k=4, s=2, pad=1) + ReLU as a single K = 4*h2 dot ------------
    # Stage conv_1 rows by parity with a single zero halo row each, so conv_2's
    # stride-2 taps are static views.  Only halo rows are zeroed; interiors are
    # fully overwritten.
    e_scr[:, 0:1, :] = jnp.zeros((batch, 1, h2), jnp.float32)
    o_scr[:, l:l + 1, :] = jnp.zeros((batch, 1, h2), jnp.float32)
    e_scr[:, 1:l + 1, :] = y1o.reshape(batch, l, h2)   # y1_pad[2v]   = y1[2v-1]
    o_scr[:, 0:l, :] = y1e.reshape(batch, l, h2)       # y1_pad[2v+1] = y1[2v]
    x2 = jnp.concatenate(
        [e_scr[:, 0:l, :], o_scr[:, 0:l, :],
         e_scr[:, 1:l + 1, :], o_scr[:, 1:l + 1, :]],
        axis=-1).reshape(m, 4 * h2)
    y2 = jnp.maximum(
        jnp.dot(x2, w2_ref[...], preferred_element_type=jnp.float32)
        + b2_ref[...], 0.0)

    # --- k=3 / pad=1 convs: taps stacked along K through zero-halo scratch ---
    k3_scr[:, 0:1, :] = jnp.zeros((batch, 1, hid), jnp.float32)
    k3_scr[:, l + 1:l + 2, :] = jnp.zeros((batch, 1, hid), jnp.float32)

    def im2col_k3(v):
        k3_scr[:, 1:l + 1, :] = v.reshape(batch, l, hid)
        return jnp.concatenate(
            [k3_scr[:, 0:l, :], k3_scr[:, 1:l + 1, :], k3_scr[:, 2:l + 2, :]],
            axis=-1).reshape(m, 3 * hid)

    # conv_3 (bias, no activation)
    x = jnp.dot(im2col_k3(y2), w3_ref[...],
                preferred_element_type=jnp.float32) + b3_ref[...]

    # residual stack: x += Conv1x1(relu(Conv3x3(relu(x)))); trailing stack ReLU
    for i in range(n_res):
        h = jnp.dot(im2col_k3(jnp.maximum(x, 0.0)), wr3_ref[i],
                    preferred_element_type=jnp.float32)
        x = x + jnp.dot(jnp.maximum(h, 0.0), wr1_ref[i],
                        preferred_element_type=jnp.float32)
    y = jnp.maximum(x, 0.0)

    # --- lane-dense final store: (M, hid) -> (8, M/8*hid) --------------------
    # Built from 8-aligned sublane slices + one lane concat (safe lowering);
    # the wrapper undoes this static permutation inside its output transpose.
    if pack_rows:
        o_ref[...] = jnp.concatenate(
            [y[pack_rows * i:pack_rows * (i + 1), :]
             for i in range(m // pack_rows)], axis=-1)
    else:
        o_ref[...] = y


# ------------------------- weight packing (one-time) -------------------------


def pack_params(params):
    """Pack PyTorch-layout conv weights into im2col matmul form (done once)."""
    w1, b1 = params["w1"], params["b1"]          # (h2, Cin, 4), (h2,)
    w2, b2 = params["w2"], params["b2"]          # (H, h2, 4), (H,)
    w3, b3 = params["w3"], params["b3"]          # (H, H, 3), (H,)
    h2, cin, _ = w1.shape
    hid = w2.shape[0]
    return dict(
        w1=jnp.transpose(w1, (2, 1, 0)).reshape(4 * cin, h2),
        b1=b1.reshape(1, h2),
        w2=jnp.transpose(w2, (2, 1, 0)).reshape(4 * h2, hid),
        b2=b2.reshape(1, hid),
        w3=jnp.transpose(w3, (2, 1, 0)).reshape(3 * hid, hid),
        b3=b3.reshape(1, hid),
        wr3=jnp.stack([jnp.transpose(wr3, (2, 1, 0)).reshape(3 * hid, wr3.shape[0])
                       for wr3, _ in params["res"]]),             # (nres, 3H, R)
        wr1=jnp.stack([wr1[:, :, 0].T for _, wr1 in params["res"]]),  # (nres, R, H)
    )


# ------------------------------ full forward ---------------------------------


def imu_encoder_forward(x_ncl, packed):
    """Matches IMUEncoder.forward: NCL in, NCL out (length shrinks by 4x)."""
    B, cin, L = x_ncl.shape
    h2 = packed["w1"].shape[1]
    hid = packed["w2"].shape[1]
    n_res = packed["wr3"].shape[0]
    assert L % 4 == 0, L
    l2 = L // 4
    M = B * l2

    # Wrapper-side prep: transpose (required, NCL input), a free row-major
    # reshape packing 4 timesteps per row, and a 1-row zero-halo pad.
    x_nlc = jnp.transpose(x_ncl, (0, 2, 1))              # (B, L, Cin)
    xq = x_nlc.reshape(B, l2, 4 * cin)                   # 4 steps per row (free)
    xq_pad = jnp.pad(xq, ((0, 0), (1, 1), (0, 0)))       # zero halo rows

    pack_rows = 8 if M % 8 == 0 else 0                   # lane-dense when possible
    if pack_rows:
        out_shape = jax.ShapeDtypeStruct((pack_rows, (M // pack_rows) * hid),
                                         jnp.float32)
    else:
        out_shape = jax.ShapeDtypeStruct((M, hid), jnp.float32)

    kernel = functools.partial(_fused_encoder_kernel, batch=B, l_out=l2,
                               cin=cin, n_res=n_res, pack_rows=pack_rows)
    out = pl.pallas_call(
        kernel,
        out_shape=out_shape,
        scratch_shapes=[
            pltpu.VMEM((B, l2 + 1, h2), jnp.float32),    # conv_1 odd rows (+halo)
            pltpu.VMEM((B, l2 + 1, h2), jnp.float32),    # conv_1 even rows (+halo)
            pltpu.VMEM((B, l2 + 2, hid), jnp.float32),   # k=3 conv staging
        ],
    )(xq_pad, packed["w1"], packed["b1"], packed["w2"], packed["b2"],
      packed["w3"], packed["b3"], packed["wr3"], packed["wr1"])

    if pack_rows:
        y = out.reshape(pack_rows, M // pack_rows, hid)
        y = jnp.transpose(y, (1, 0, 2)).reshape(M, hid)  # undo lane packing
    else:
        y = out
    return jnp.transpose(y.reshape(B, l2, hid), (0, 2, 1))   # NLC -> NCL


# --------------------- deterministic parameter init -------------------------


def init_params(key, in_channels, num_hiddens, num_residual_layers,
                num_residual_hiddens):
    h2 = num_hiddens // 2

    def conv_init(k, cout, cin, ksz, bias=True):
        kw, kb = jax.random.split(k)
        bound = 1.0 / jnp.sqrt(jnp.float32(cin * ksz))
        w = jax.random.uniform(kw, (cout, cin, ksz), jnp.float32, -bound, bound)
        b = (jax.random.uniform(kb, (cout,), jnp.float32, -bound, bound)
             if bias else None)
        return w, b

    keys = jax.random.split(key, 3 + 2 * num_residual_layers)
    w1, b1 = conv_init(keys[0], h2, in_channels, 4)
    w2, b2 = conv_init(keys[1], num_hiddens, h2, 4)
    w3, b3 = conv_init(keys[2], num_hiddens, num_hiddens, 3)
    res = []
    for i in range(num_residual_layers):
        wr3, _ = conv_init(keys[3 + 2 * i], num_residual_hiddens, num_hiddens, 3,
                           bias=False)
        wr1, _ = conv_init(keys[4 + 2 * i], num_hiddens, num_residual_hiddens, 1,
                           bias=False)
        res.append((wr3, wr1))
    return dict(w1=w1, b1=b1, w2=w2, b2=b2, w3=w3, b3=b3, res=res)


# --------------------------- pure-JAX reference ------------------------------


def _conv1d_ref(x, w, b, stride, pad):
    y = jax.lax.conv_general_dilated(
        x, w, window_strides=(stride,), padding=[(pad, pad)],
        dimension_numbers=("NCH", "OIH", "NCH"))
    if b is not None:
        y = y + b[None, :, None]
    return y


def encoder_ref(x_ncl, params):
    y = jax.nn.relu(_conv1d_ref(x_ncl, params["w1"], params["b1"], 2, 1))
    y = jax.nn.relu(_conv1d_ref(y, params["w2"], params["b2"], 2, 1))
    y = _conv1d_ref(y, params["w3"], params["b3"], 1, 1)
    for wr3, wr1 in params["res"]:
        h = jax.nn.relu(y)
        h = jax.nn.relu(_conv1d_ref(h, wr3, None, 1, 1))
        h = _conv1d_ref(h, wr1, None, 1, 0)
        y = y + h
    return jax.nn.relu(y)


# --------------------------------- main --------------------------------------


if __name__ == "__main__":
    B, Cin, L = 2, 6, 64                  # IMU-like: 6 channels, 64 timesteps
    num_hiddens, num_res_layers, num_res_hiddens = 32, 2, 8

    key = jax.random.PRNGKey(0)
    kx, kp = jax.random.split(key)
    x = jax.random.normal(kx, (B, Cin, L), jnp.float32)
    params = init_params(kp, Cin, num_hiddens, num_res_layers, num_res_hiddens)

    packed = pack_params(params)          # packed/transposed once, outside jit

    fwd = jax.jit(lambda a: imu_encoder_forward(a, packed))
    out = jax.block_until_ready(fwd(x))

    assert out.shape == (B, num_hiddens, L // 4), out.shape
    ref = encoder_ref(x, params)
    max_err = float(jnp.max(jnp.abs(out - ref)))
    assert jnp.allclose(out, ref, atol=1e-4, rtol=1e-4), max_err

    print("KERNEL_OK")
</pallas_src>

<mosaic_0001>
module attributes {stable_mosaic.version = 11 : i64} {
  func.func @_fused_encoder_kernel(%arg0: memref<2x18x24xf32, #tpu.memory_space<vmem>>, %arg1: memref<24x16xf32, #tpu.memory_space<vmem>>, %arg2: memref<1x16xf32, #tpu.memory_space<vmem>>, %arg3: memref<64x32xf32, #tpu.memory_space<vmem>>, %arg4: memref<1x32xf32, #tpu.memory_space<vmem>>, %arg5: memref<96x32xf32, #tpu.memory_space<vmem>>, %arg6: memref<1x32xf32, #tpu.memory_space<vmem>>, %arg7: memref<2x96x8xf32, #tpu.memory_space<vmem>>, %arg8: memref<2x8x32xf32, #tpu.memory_space<vmem>>, %arg9: memref<8x128xf32, #tpu.memory_space<vmem>>, %arg10: memref<2x17x16xf32, #tpu.memory_space<vmem>>, %arg11: memref<2x17x16xf32, #tpu.memory_space<vmem>>, %arg12: memref<2x18x32xf32, #tpu.memory_space<vmem>>) attributes {dimension_semantics = [], scalar_prefetch = 0 : i64, scratch_operands = 3 : i64, tpu.core_type = #tpu.core_type<tc>} {
    %c0 = arith.constant 0 : index
    %c0_0 = arith.constant 0 : index
    %c18 = arith.constant 18 : index
    %0 = vector.load %arg0[%c0, %c0_0, %c18] : memref<2x18x24xf32, #tpu.memory_space<vmem>>, vector<2x16x6xf32>
    %c0_1 = arith.constant 0 : index
    %c1 = arith.constant 1 : index
    %c0_2 = arith.constant 0 : index
    %1 = vector.load %arg0[%c0_1, %c1, %c0_2] : memref<2x18x24xf32, #tpu.memory_space<vmem>>, vector<2x16x6xf32>
    %c0_3 = arith.constant 0 : index
    %c1_4 = arith.constant 1 : index
    %c6 = arith.constant 6 : index
    %2 = vector.load %arg0[%c0_3, %c1_4, %c6] : memref<2x18x24xf32, #tpu.memory_space<vmem>>, vector<2x16x6xf32>
    %c0_5 = arith.constant 0 : index
    %c1_6 = arith.constant 1 : index
    %c12 = arith.constant 12 : index
    %3 = vector.load %arg0[%c0_5, %c1_6, %c12] : memref<2x18x24xf32, #tpu.memory_space<vmem>>, vector<2x16x6xf32>
    %4 = tpu.concatenate %0, %1, %2, %3 in 2 : vector<2x16x6xf32>, vector<2x16x6xf32>, vector<2x16x6xf32>, vector<2x16x6xf32> -> vector<2x16x24xf32>
    %5 = vector.shape_cast %4 : vector<2x16x24xf32> to vector<32x24xf32>
    %c0_7 = arith.constant 0 : index
    %c1_8 = arith.constant 1 : index
    %c6_9 = arith.constant 6 : index
    %6 = vector.load %arg0[%c0_7, %c1_8, %c6_9] : memref<2x18x24xf32, #tpu.memory_space<vmem>>, vector<2x16x6xf32>
    %c0_10 = arith.constant 0 : index
    %c1_11 = arith.constant 1 : index
    %c12_12 = arith.constant 12 : index
    %7 = vector.load %arg0[%c0_10, %c1_11, %c12_12] : memref<2x18x24xf32, #tpu.memory_space<vmem>>, vector<2x16x6xf32>
    %c0_13 = arith.constant 0 : index
    %c1_14 = arith.constant 1 : index
    %c18_15 = arith.constant 18 : index
    %8 = vector.load %arg0[%c0_13, %c1_14, %c18_15] : memref<2x18x24xf32, #tpu.memory_space<vmem>>, vector<2x16x6xf32>
    %c0_16 = arith.constant 0 : index
    %c2 = arith.constant 2 : index
    %c0_17 = arith.constant 0 : index
    %9 = vector.load %arg0[%c0_16, %c2, %c0_17] : memref<2x18x24xf32, #tpu.memory_space<vmem>>, vector<2x16x6xf32>
    %10 = tpu.concatenate %6, %7, %8, %9 in 2 : vector<2x16x6xf32>, vector<2x16x6xf32>, vector<2x16x6xf32>, vector<2x16x6xf32> -> vector<2x16x24xf32>
    %11 = vector.shape_cast %10 : vector<2x16x24xf32> to vector<32x24xf32>
    %12 = tpu.concatenate %5, %11 in 0 : vector<32x24xf32>, vector<32x24xf32> -> vector<64x24xf32>
    %c0_18 = arith.constant 0 : index
    %c0_19 = arith.constant 0 : index
    %13 = vector.load %arg1[%c0_18, %c0_19] : memref<24x16xf32, #tpu.memory_space<vmem>>, vector<24x16xf32>
    %cst = arith.constant dense<0.000000e+00> : vector<64x16xf32>
    %14 = tpu.matmul %12, %13, %cst {dimension_numbers = #tpu.dot_dimension_numbers<[1], [0], [0], [1], [0, 0, 1, 1], [], []>} : vector<64x24xf32>, vector<24x16xf32>, vector<64x16xf32> -> vector<64x16xf32>
    %c0_20 = arith.constant 0 : index
    %c0_21 = arith.constant 0 : index
    %15 = vector.load %arg2[%c0_20, %c0_21] : memref<1x16xf32, #tpu.memory_space<vmem>>, vector<1x16xf32>
    %16 = vector.broadcast %15 : vector<1x16xf32> to vector<64x16xf32>
    %17 = arith.addf %14, %16 : vector<64x16xf32>
    %cst_22 = arith.constant 0.000000e+00 : f32
    %18 = vector.broadcast %cst_22 : f32 to vector<64x16xf32>
    %19 = arith.maximumf %17, %18 : vector<64x16xf32>
    %20 = vector.extract_strided_slice %19 {offsets = [0, 0], sizes = [32, 16], strides = [1, 1]} : vector<64x16xf32> to vector<32x16xf32>
    %21 = vector.extract_strided_slice %19 {offsets = [32, 0], sizes = [32, 16], strides = [1, 1]} : vector<64x16xf32> to vector<32x16xf32>
    %cst_23 = arith.constant 0.000000e+00 : f32
    %22 = vector.broadcast %cst_23 : f32 to vector<2x1x16xf32>
    %c0_24 = arith.constant 0 : index
    %c0_25 = arith.constant 0 : index
    %c0_26 = arith.constant 0 : index
    %23 = vector.load %arg10[%c0_24, %c0_25, %c0_26] : memref<2x17x16xf32, #tpu.memory_space<vmem>>, vector<2x1x16xf32>
    tpu.vector_store %arg10[%c0_24, %c0_25, %c0_26], %22 {strides = array<i32>} : memref<2x17x16xf32, #tpu.memory_space<vmem>>, vector<2x1x16xf32>,
    %cst_27 = arith.constant 0.000000e+00 : f32
    %24 = vector.broadcast %cst_27 : f32 to vector<2x1x16xf32>
    %c0_28 = arith.constant 0 : index
    %c16 = arith.constant 16 : index
    %c0_29 = arith.constant 0 : index
    %25 = vector.load %arg11[%c0_28, %c16, %c0_29] : memref<2x17x16xf32, #tpu.memory_space<vmem>>, vector<2x1x16xf32>
    tpu.vector_store %arg11[%c0_28, %c16, %c0_29], %24 {strides = array<i32>} : memref<2x17x16xf32, #tpu.memory_space<vmem>>, vector<2x1x16xf32>,
    %26 = vector.shape_cast %21 : vector<32x16xf32> to vector<2x16x16xf32>
    %c0_30 = arith.constant 0 : index
    %c1_31 = arith.constant 1 : index
    %c0_32 = arith.constant 0 : index
    %27 = vector.load %arg10[%c0_30, %c1_31, %c0_32] : memref<2x17x16xf32, #tpu.memory_space<vmem>>, vector<2x16x16xf32>
    tpu.vector_store %arg10[%c0_30, %c1_31, %c0_32], %26 {strides = array<i32>} : memref<2x17x16xf32, #tpu.memory_space<vmem>>, vector<2x16x16xf32>,
    %28 = vector.shape_cast %20 : vector<32x16xf32> to vector<2x16x16xf32>
    %c0_33 = arith.constant 0 : index
    %c0_34 = arith.constant 0 : index
    %c0_35 = arith.constant 0 : index
    %29 = vector.load %arg11[%c0_33, %c0_34, %c0_35] : memref<2x17x16xf32, #tpu.memory_space<vmem>>, vector<2x16x16xf32>
    tpu.vector_store %arg11[%c0_33, %c0_34, %c0_35], %28 {strides = array<i32>} : memref<2x17x16xf32, #tpu.memory_space<vmem>>, vector<2x16x16xf32>,
    %c0_36 = arith.constant 0 : index
    %c0_37 = arith.constant 0 : index
    %c0_38 = arith.constant 0 : index
    %30 = vector.load %arg10[%c0_36, %c0_37, %c0_38] : memref<2x17x16xf32, #tpu.memory_space<vmem>>, vector<2x16x16xf32>
    %c0_39 = arith.constant 0 : index
    %c0_40 = arith.constant 0 : index
    %c0_41 = arith.constant 0 : index
    %31 = vector.load %arg11[%c0_39, %c0_40, %c0_41] : memref<2x17x16xf32, #tpu.memory_space<vmem>>, vector<2x16x16xf32>
    %c0_42 = arith.constant 0 : index
    %c1_43 = arith.constant 1 : index
    %c0_44 = arith.constant 0 : index
    %32 = vector.load %arg10[%c0_42, %c1_43, %c0_44] : memref<2x17x16xf32, #tpu.memory_space<vmem>>, vector<2x16x16xf32>
    %c0_45 = arith.constant 0 : index
    %c1_46 = arith.constant 1 : index
    %c0_47 = arith.constant 0 : index
    %33 = vector.load %arg11[%c0_45, %c1_46, %c0_47] : memref<2x17x16xf32, #tpu.memory_space<vmem>>, vector<2x16x16xf32>
    %34 = tpu.concatenate %30, %31, %32, %33 in 2 : vector<2x16x16xf32>, vector<2x16x16xf32>, vector<2x16x16xf32>, vector<2x16x16xf32> -> vector<2x16x64xf32>
    %35 = vector.shape_cast %34 : vector<2x16x64xf32> to vector<32x64xf32>
    %c0_48 = arith.constant 0 : index
    %c0_49 = arith.constant 0 : index
    %36 = vector.load %arg3[%c0_48, %c0_49] : memref<64x32xf32, #tpu.memory_space<vmem>>, vector<64x32xf32>
    %cst_50 = arith.constant dense<0.000000e+00> : vector<32x32xf32>
    %37 = tpu.matmul %35, %36, %cst_50 {dimension_numbers = #tpu.dot_dimension_numbers<[1], [0], [0], [1], [0, 0, 1, 1], [], []>} : vector<32x64xf32>, vector<64x32xf32>, vector<32x32xf32> -> vector<32x32xf32>
    %c0_51 = arith.constant 0 : index
    %c0_52 = arith.constant 0 : index
    %38 = vector.load %arg4[%c0_51, %c0_52] : memref<1x32xf32, #tpu.memory_space<vmem>>, vector<1x32xf32>
    %39 = vector.broadcast %38 : vector<1x32xf32> to vector<32x32xf32>
    %40 = arith.addf %37, %39 : vector<32x32xf32>
    %cst_53 = arith.constant 0.000000e+00 : f32
    %41 = vector.broadcast %cst_53 : f32 to vector<32x32xf32>
    %42 = arith.maximumf %40, %41 : vector<32x32xf32>
    %cst_54 = arith.constant 0.000000e+00 : f32
    %43 = vector.broadcast %cst_54 : f32 to vector<2x1x32xf32>
    %c0_55 = arith.constant 0 : index
    %c0_56 = arith.constant 0 : index
    %c0_57 = arith.constant 0 : index
    %44 = vector.load %arg12[%c0_55, %c0_56, %c0_57] : memref<2x18x32xf32, #tpu.memory_space<vmem>>, vector<2x1x32xf32>
    tpu.vector_store %arg12[%c0_55, %c0_56, %c0_57], %43 {strides = array<i32>} : memref<2x18x32xf32, #tpu.memory_space<vmem>>, vector<2x1x32xf32>,
    %cst_58 = arith.constant 0.000000e+00 : f32
    %45 = vector.broadcast %cst_58 : f32 to vector<2x1x32xf32>
    %c0_59 = arith.constant 0 : index
    %c17 = arith.constant 17 : index
    %c0_60 = arith.constant 0 : index
    %46 = vector.load %arg12[%c0_59, %c17, %c0_60] : memref<2x18x32xf32, #tpu.memory_space<vmem>>, vector<2x1x32xf32>
    tpu.vector_store %arg12[%c0_59, %c17, %c0_60], %45 {strides = array<i32>} : memref<2x18x32xf32, #tpu.memory_space<vmem>>, vector<2x1x32xf32>,
    %47 = vector.shape_cast %42 : vector<32x32xf32> to vector<2x16x32xf32>
    %c0_61 = arith.constant 0 : index
    %c1_62 = arith.constant 1 : index
    %c0_63 = arith.constant 0 : index
    %48 = vector.load %arg12[%c0_61, %c1_62, %c0_63] : memref<2x18x32xf32, #tpu.memory_space<vmem>>, vector<2x16x32xf32>
    tpu.vector_store %arg12[%c0_61, %c1_62, %c0_63], %47 {strides = array<i32>} : memref<2x18x32xf32, #tpu.memory_space<vmem>>, vector<2x16x32xf32>,
    %c0_64 = arith.constant 0 : index
    %c0_65 = arith.constant 0 : index
    %c0_66 = arith.constant 0 : index
    %49 = vector.load %arg12[%c0_64, %c0_65, %c0_66] : memref<2x18x32xf32, #tpu.memory_space<vmem>>, vector<2x16x32xf32>
    %c0_67 = arith.constant 0 : index
    %c1_68 = arith.constant 1 : index
    %c0_69 = arith.constant 0 : index
    %50 = vector.load %arg12[%c0_67, %c1_68, %c0_69] : memref<2x18x32xf32, #tpu.memory_space<vmem>>, vector<2x16x32xf32>
    %c0_70 = arith.constant 0 : index
    %c2_71 = arith.constant 2 : index
    %c0_72 = arith.constant 0 : index
    %51 = vector.load %arg12[%c0_70, %c2_71, %c0_72] : memref<2x18x32xf32, #tpu.memory_space<vmem>>, vector<2x16x32xf32>
    %52 = tpu.concatenate %49, %50, %51 in 2 : vector<2x16x32xf32>, vector<2x16x32xf32>, vector<2x16x32xf32> -> vector<2x16x96xf32>
    %53 = vector.shape_cast %52 : vector<2x16x96xf32> to vector<32x96xf32>
    %c0_73 = arith.constant 0 : index
    %c0_74 = arith.constant 0 : index
    %54 = vector.load %arg5[%c0_73, %c0_74] : memref<96x32xf32, #tpu.memory_space<vmem>>, vector<96x32xf32>
    %cst_75 = arith.constant dense<0.000000e+00> : vector<32x32xf32>
    %55 = tpu.matmul %53, %54, %cst_75 {dimension_numbers = #tpu.dot_dimension_numbers<[1], [0], [0], [1], [0, 0, 1, 1], [], []>} : vector<32x96xf32>, vector<96x32xf32>, vector<32x32xf32> -> vector<32x32xf32>
    %c0_76 = arith.constant 0 : index
    %c0_77 = arith.constant 0 : index
    %56 = vector.load %arg6[%c0_76, %c0_77] : memref<1x32xf32, #tpu.memory_space<vmem>>, vector<1x32xf32>
    %57 = vector.broadcast %56 : vector<1x32xf32> to vector<32x32xf32>
    %58 = arith.addf %55, %57 : vector<32x32xf32>
    %cst_78 = arith.constant 0.000000e+00 : f32
    %59 = vector.broadcast %cst_78 : f32 to vector<32x32xf32>
    %60 = arith.maximumf %58, %59 : vector<32x32xf32>
    %61 = vector.shape_cast %60 : vector<32x32xf32> to vector<2x16x32xf32>
    %c0_79 = arith.constant 0 : index
    %c1_80 = arith.constant 1 : index
    %c0_81 = arith.constant 0 : index
    %62 = vector.load %arg12[%c0_79, %c1_80, %c0_81] : memref<2x18x32xf32, #tpu.memory_space<vmem>>, vector<2x16x32xf32>
    tpu.vector_store %arg12[%c0_79, %c1_80, %c0_81], %61 {strides = array<i32>} : memref<2x18x32xf32, #tpu.memory_space<vmem>>, vector<2x16x32xf32>,
    %c0_82 = arith.constant 0 : index
    %c0_83 = arith.constant 0 : index
    %c0_84 = arith.constant 0 : index
    %63 = vector.load %arg12[%c0_82, %c0_83, %c0_84] : memref<2x18x32xf32, #tpu.memory_space<vmem>>, vector<2x16x32xf32>
    %c0_85 = arith.constant 0 : index
    %c1_86 = arith.constant 1 : index
    %c0_87 = arith.constant 0 : index
    %64 = vector.load %arg12[%c0_85, %c1_86, %c0_87] : memref<2x18x32xf32, #tpu.memory_space<vmem>>, vector<2x16x32xf32>
    %c0_88 = arith.constant 0 : index
    %c2_89 = arith.constant 2 : index
    %c0_90 = arith.constant 0 : index
    %65 = vector.load %arg12[%c0_88, %c2_89, %c0_90] : memref<2x18x32xf32, #tpu.memory_space<vmem>>, vector<2x16x32xf32>
    %66 = tpu.concatenate %63, %64, %65 in 2 : vector<2x16x32xf32>, vector<2x16x32xf32>, vector<2x16x32xf32> -> vector<2x16x96xf32>
    %67 = vector.shape_cast %66 : vector<2x16x96xf32> to vector<32x96xf32>
    %c0_91 = arith.constant 0 : index
    %c0_92 = arith.constant 0 : index
    %c0_93 = arith.constant 0 : index
    %68 = vector.load %arg7[%c0_91, %c0_92, %c0_93] : memref<2x96x8xf32, #tpu.memory_space<vmem>>, vector<1x96x8xf32>
    %69 = vector.shape_cast %68 : vector<1x96x8xf32> to vector<96x8xf32>
    %cst_94 = arith.constant dense<0.000000e+00> : vector<32x8xf32>
    %70 = tpu.matmul %67, %69, %cst_94 {dimension_numbers = #tpu.dot_dimension_numbers<[1], [0], [0], [1], [0, 0, 1, 1], [], []>} : vector<32x96xf32>, vector<96x8xf32>, vector<32x8xf32> -> vector<32x8xf32>
    %cst_95 = arith.constant 0.000000e+00 : f32
    %71 = vector.broadcast %cst_95 : f32 to vector<32x8xf32>
    %72 = arith.maximumf %70, %71 : vector<32x8xf32>
    %c0_96 = arith.constant 0 : index
    %c0_97 = arith.constant 0 : index
    %c0_98 = arith.constant 0 : index
    %73 = vector.load %arg8[%c0_96, %c0_97, %c0_98] : memref<2x8x32xf32, #tpu.memory_space<vmem>>, vector<1x8x32xf32>
    %74 = vector.shape_cast %73 : vector<1x8x32xf32> to vector<8x32xf32>
    %cst_99 = arith.constant dense<0.000000e+00> : vector<32x32xf32>
    %75 = tpu.matmul %72, %74, %cst_99 {dimension_numbers = #tpu.dot_dimension_numbers<[1], [0], [0], [1], [0, 0, 1, 1], [], []>} : vector<32x8xf32>, vector<8x32xf32>, vector<32x32xf32> -> vector<32x32xf32>
    %76 = arith.addf %58, %75 : vector<32x32xf32>
    %cst_100 = arith.constant 0.000000e+00 : f32
    %77 = vector.broadcast %cst_100 : f32 to vector<32x32xf32>
    %78 = arith.maximumf %76, %77 : vector<32x32xf32>
    %79 = vector.shape_cast %78 : vector<32x32xf32> to vector<2x16x32xf32>
    %c0_101 = arith.constant 0 : index
    %c1_102 = arith.constant 1 : index
    %c0_103 = arith.constant 0 : index
    %80 = vector.load %arg12[%c0_101, %c1_102, %c0_103] : memref<2x18x32xf32, #tpu.memory_space<vmem>>, vector<2x16x32xf32>
    tpu.vector_store %arg12[%c0_101, %c1_102, %c0_103], %79 {strides = array<i32>} : memref<2x18x32xf32, #tpu.memory_space<vmem>>, vector<2x16x32xf32>,
    %c0_104 = arith.constant 0 : index
    %c0_105 = arith.constant 0 : index
    %c0_106 = arith.constant 0 : index
    %81 = vector.load %arg12[%c0_104, %c0_105, %c0_106] : memref<2x18x32xf32, #tpu.memory_space<vmem>>, vector<2x16x32xf32>
    %c0_107 = arith.constant 0 : index
    %c1_108 = arith.constant 1 : index
    %c0_109 = arith.constant 0 : index
    %82 = vector.load %arg12[%c0_107, %c1_108, %c0_109] : memref<2x18x32xf32, #tpu.memory_space<vmem>>, vector<2x16x32xf32>
    %c0_110 = arith.constant 0 : index
    %c2_111 = arith.constant 2 : index
    %c0_112 = arith.constant 0 : index
    %83 = vector.load %arg12[%c0_110, %c2_111, %c0_112] : memref<2x18x32xf32, #tpu.memory_space<vmem>>, vector<2x16x32xf32>
    %84 = tpu.concatenate %81, %82, %83 in 2 : vector<2x16x32xf32>, vector<2x16x32xf32>, vector<2x16x32xf32> -> vector<2x16x96xf32>
    %85 = vector.shape_cast %84 : vector<2x16x96xf32> to vector<32x96xf32>
    %c1_113 = arith.constant 1 : index
    %c0_114 = arith.constant 0 : index
    %c0_115 = arith.constant 0 : index
    %86 = vector.load %arg7[%c1_113, %c0_114, %c0_115] : memref<2x96x8xf32, #tpu.memory_space<vmem>>, vector<1x96x8xf32>
    %87 = vector.shape_cast %86 : vector<1x96x8xf32> to vector<96x8xf32>
    %cst_116 = arith.constant dense<0.000000e+00> : vector<32x8xf32>
    %88 = tpu.matmul %85, %87, %cst_116 {dimension_numbers = #tpu.dot_dimension_numbers<[1], [0], [0], [1], [0, 0, 1, 1], [], []>} : vector<32x96xf32>, vector<96x8xf32>, vector<32x8xf32> -> vector<32x8xf32>
    %cst_117 = arith.constant 0.000000e+00 : f32
    %89 = vector.broadcast %cst_117 : f32 to vector<32x8xf32>
    %90 = arith.maximumf %88, %89 : vector<32x8xf32>
    %c1_118 = arith.constant 1 : index
    %c0_119 = arith.constant 0 : index
    %c0_120 = arith.constant 0 : index
    %91 = vector.load %arg8[%c1_118, %c0_119, %c0_120] : memref<2x8x32xf32, #tpu.memory_space<vmem>>, vector<1x8x32xf32>
    %92 = vector.shape_cast %91 : vector<1x8x32xf32> to vector<8x32xf32>
    %cst_121 = arith.constant dense<0.000000e+00> : vector<32x32xf32>
    %93 = tpu.matmul %90, %92, %cst_121 {dimension_numbers = #tpu.dot_dimension_numbers<[1], [0], [0], [1], [0, 0, 1, 1], [], []>} : vector<32x8xf32>, vector<8x32xf32>, vector<32x32xf32> -> vector<32x32xf32>
    %94 = arith.addf %76, %93 : vector<32x32xf32>
    %cst_122 = arith.constant 0.000000e+00 : f32
    %95 = vector.broadcast %cst_122 : f32 to vector<32x32xf32>
    %96 = arith.maximumf %94, %95 : vector<32x32xf32>
    %97 = vector.extract_strided_slice %96 {offsets = [0, 0], sizes = [8, 32], strides = [1, 1]} : vector<32x32xf32> to vector<8x32xf32>
    %98 = vector.extract_strided_slice %96 {offsets = [8, 0], sizes = [8, 32], strides = [1, 1]} : vector<32x32xf32> to vector<8x32xf32>
    %99 = vector.extract_strided_slice %96 {offsets = [16, 0], sizes = [8, 32], strides = [1, 1]} : vector<32x32xf32> to vector<8x32xf32>
    %100 = vector.extract_strided_slice %96 {offsets = [24, 0], sizes = [8, 32], strides = [1, 1]} : vector<32x32xf32> to vector<8x32xf32>
    %101 = tpu.concatenate %97, %98, %99, %100 in 1 : vector<8x32xf32>, vector<8x32xf32>, vector<8x32xf32>, vector<8x32xf32> -> vector<8x128xf32>
    %c0_123 = arith.constant 0 : index
    %c0_124 = arith.constant 0 : index
    %102 = vector.load %arg9[%c0_123, %c0_124] : memref<8x128xf32, #tpu.memory_space<vmem>>, vector<8x128xf32>
    tpu.vector_store %arg9[%c0_123, %c0_124], %101 {strides = array<i32>} : memref<8x128xf32, #tpu.memory_space<vmem>>, vector<8x128xf32>,
    return
  }
}

</mosaic_0001>

<bundles_post_ra>
// kernel: _lambda_.1
= control target key start
LH: loop header
LB: loop body
LE: loop exit
PB: predicated region body
PF: predicated region fallthrough
CT: control target
= control target key end

     0   :  { %14 = vsyncpa [#allocation6], 0  ;;  %s945_s12 = smov [#allocation5]   ;;  %s946_s14 = smov 128   ;;  %s1381_s0 = inlined_call_operand.vmem [shape: f32[2,18,24], index: 0, kind: input, shape index: {}]   ;;  %s1382_s1 = inlined_call_operand.vmem [shape: f32[24,16], index: 1, kind: input, shape index: {}]   ;;  %s1383_s2 = inlined_call_operand.vmem [shape: f32[1,16], index: 2, kind: input, shape index: {}]   ;;  %s1384_s3 = inlined_call_operand.vmem [shape: f32[64,32], index: 3, kind: input, shape index: {}]   ;;  %s1385_s4 = inlined_call_operand.vmem [shape: f32[1,32], index: 4, kind: input, shape index: {}]   ;;  %s1386_s5 = inlined_call_operand.vmem [shape: f32[96,32], index: 5, kind: input, shape index: {}]   ;;  %s1387_s6 = inlined_call_operand.vmem [shape: f32[1,32], index: 6, kind: input, shape index: {}]   ;;  %s1388_s7 = inlined_call_operand.vmem [shape: f32[2,96,8], index: 7, kind: input, shape index: {}]   ;;  %s1389_s8 = inlined_call_operand.hbm [shape: f32[2,8,32], index: 8, kind: input, shape index: {}]   ;;  %s1390_s9 = inlined_call_operand.vmem [shape: f32[8,128], index: 9, kind: output, shape index: {}]  }
   0x1   :  { %s35_s11 = sshll.u32 %s1389_s8, 4  ;;  %s37_s13 = sshll.u32 %s945_s12, 4  ;;  %s36_s11 = int_to_ptr.hbm [resolvable:$true] %s35_s11  ;;  %s38_s13 = int_to_ptr.vmem [resolvable:$true] %s37_s13 }
   0x2   :  { %s947_s15 = smov 8  }
   0x3   :  { %43 = dma.hbm_to_vmem [thread:$0]  %s36_s11, 256, %s38_s13, [#allocation6], %s946_s14, %s946_s14, %s947_s15  }
   0x4   :  { %943 = dma.done.wait [#allocation6], 256  }
   0x5   :  { %944 = vsyncadd [#allocation6], 4294967040  ;;  %v49_v0 = vld [vmem:[%s1381_s0 + $0x8] sm:$0xff]  ;;  %v48_v1 = vld [vmem:[%s1381_s0] sm:$0xff]  ;;  %s948_s20 = smov 110   ;;  %s949_s28 = smov 6  }
   0x6   :  { %62 = vrot.lane.b32.xlu1 %v49_v0, %s948_s20  ;;  %60 = vrot.lane.b32.xlu0 %v48_v1, %s948_s20  ;;  %v50_v2 = vld [vmem:[%s1381_s0 + $0x18] sm:$0xff]  ;;  %v53_v3 = vld [vmem:[%s1381_s0 + $0x9] sm:$0xff]  ;;  %s950_s12 = smov 122   ;;  %s951_s17 = smov 18   ;;  %vm88_vm0 = vcmask 48128   ;;  %vm93_vm1 = vcmask 97280  }
   0x7   :  { %64 = vrot.lane.b32.xlu2 %v50_v2, %s948_s20  ;;  %v52_v4 = vld [vmem:[%s1381_s0 + $0x1] sm:$0xff]  ;;  %v54_v5 = vld [vmem:[%s1381_s0 + $0x19] sm:$0xff]  ;;  %v104_v9 = vld [vmem:[%s1381_s0 + $0xa] sm:$0xff]  ;;  %vm98_vm2 = vcmask 146432   ;;  %vm150_vm3 = vcmask 195584   ;;  %vm224_vm4 = vcmask 122880  }
   0x8   :  { %v55_v6 = vld [vmem:[%s1381_s0 + $0x21] sm:$0xff]  ;;  %v145_v12 = vld [vmem:[%s1382_s1 + $0x10] sm:$0xff]  ;;  %v952_v47 = vmov 0.0   ;;  %v916_v48 = vld [vmem:[%s1383_s2] ss:$0 sm:$0xff]  ;;  %vm229_vm5 = vcmask 130048  }
   0x9   :  { %v51_v7 = vld [vmem:[%s1381_s0 + $0x20] sm:$0xff]  ;;  %188 = vmatpush.msra.mxu0 %v145_v12  ;;  %v144_v13 = vld [vmem:[%s1382_s1 + $0x8] sm:$0xff]  ;;  %227 = vst.msk [vmem:[#allocation3 + $0x10] sm:$0x1] %vm224_vm4, %v952_v47  ;;  %s953_s27 = smov 16   ;;  %s954_s2 = smov 48  }
   0xa   :  { %v103_v8 = vld [vmem:[%s1381_s0 + $0x2] sm:$0xff]  ;;  %v105_v10 = vld [vmem:[%s1381_s0 + $0x1a] sm:$0xff]  ;;  %225 = vst.msk [vmem:[#allocation2] sm:$0x1] %vm224_vm4, %v952_v47  ;;  %s955_s13 = smov 32   ;;  %vm306_vm6 = vcmask 261120  }
   0xb   :  { %v106_v11 = vld [vmem:[%s1381_s0 + $0x22] sm:$0xff]  ;;  %189 = vmatpush.msra.mxu0 %v144_v13  ;;  %226 = vst.msk [vmem:[#allocation2 + $0x18] sm:$0x1] %vm224_vm4, %v952_v47  ;;  %vm311_vm7 = vcmask 392192   ;;  %vm328_vm8 = vcmask 523264   ;;  %vm374_vm9 = vcmask 253952  }
   0xc   :  { %v143_v14 = vld [vmem:[%s1382_s1] sm:$0xff]  ;;  %228 = vst.msk [vmem:[#allocation3 + $0x28] sm:$0x1] %vm224_vm4, %v952_v47  ;;  %s956_s11 = smov 64   ;;  %vm451_vm10 = vcmask 785408   ;;  %vm611_vm11 = vcmask 64512  }
   0xd   :  { %190 = vmatpush.msra.mxu0 %v143_v14  ;;  %377 = vst.msk [vmem:[#allocation4 + $0x11] sm:$0x1] %vm374_vm9, %v952_v47 }
   0xe   :  { %78 = vrot.lane.b32.xlu1 %v53_v3, %s949_s28  ;;  %76 = vrot.lane.b32.xlu0 %v52_v4, %s949_s28  ;;  %375 = vst.msk [vmem:[#allocation4] sm:$0x1] %vm374_vm9, %v952_v47 }
   0xf   :  { %80 = vrot.lane.b32.xlu2 %v54_v5, %s949_s28  ;;  %376 = vst.msk [vmem:[#allocation4 + $0x18] sm:$0x1] %vm374_vm9, %v952_v47 }
  0x10   :  { %378 = vst.msk [vmem:[#allocation4 + $0x29] sm:$0x1] %vm374_vm9, %v952_v47 }
  0x16   :  { %82 = vrot.lane.b32.xlu1 %v55_v6, %s949_s28  ;;  %66 = vrot.lane.b32.xlu0 %v51_v7, %s948_s20  ;;  %v323_v7 = vld [vmem:[%s1384_s3 + $0x38] sm:$0xff] }
  0x17   :  { %107 = vrot.lane.b32.xlu2 %v52_v4, %s950_s12  ;;  %349 = vmatpush.msra.mxu1 %v323_v7 }
  0x1e   :  { %123 = vrot.lane.b32.xlu0 %v103_v8, %s951_s17  ;;  %109 = vrot.lane.b32.xlu1 %v53_v3, %s950_s12  ;;  %v322_v8 = vld [vmem:[%s1384_s3 + $0x30] sm:$0xff] }
  0x1f   :  { %125 = vrot.lane.b32.xlu2 %v104_v9, %s951_s17  ;;  %v321_v9 = vld [vmem:[%s1384_s3 + $0x28] sm:$0xff]  ;;  %350 = vmatpush.msra.mxu1 %v322_v8 }
  0x21   :  { %351 = vmatpush.msra.mxu1 %v321_v9 }
  0x26   :  { %127 = vrot.lane.b32.xlu1 %v105_v10, %s951_s17  ;;  %111 = vrot.lane.b32.xlu0 %v54_v5, %s950_s12 }
  0x27   :  { %113 = vrot.lane.b32.xlu2 %v55_v6, %s950_s12 }
  0x2e   :  { %129 = vrot.lane.b32.xlu0 %v106_v11, %s951_s17 }
  0x61   :  { %v65_v17 = vpop.permute.xlu2 %64 }
  0x69   :  { %v81_v25 = vpop.permute.xlu2 %80 }
  0x6a   :  { %v91_v27 = vsel %vm88_vm0, %v65_v17, %v81_v25 }
  0x6b   :  { %v96_v28 = vsel %vm93_vm1, %v91_v27, %v81_v25  ;;  %v317_v27 = vld [vmem:[%s1384_s3 + $0x8] sm:$0xff] }
  0x6c   :  { %v101_v31 = vsel %vm98_vm2, %v96_v28, %v81_v25  ;;  %v319_v25 = vld [vmem:[%s1384_s3 + $0x18] sm:$0xff]  ;;  %v316_v28 = vld [vmem:[%s1384_s3] sm:$0xff] }
  0x71   :  { %v108_v35 = vpop.permute.xlu2 %107 }
  0x78   :  { %v63_v15 = vpop.permute.xlu1 %62  ;;  %v61_v16 = vpop.permute.xlu0 %60 }
  0x79   :  { %v126_v39 = vpop.permute.xlu2 %125 }
  0x80   :  { %v77_v18 = vpop.permute.xlu0 %76  ;;  %v79_v20 = vpop.permute.xlu1 %78 }
  0x81   :  { %v89_v19 = vsel %vm88_vm0, %v61_v16, %v77_v18  ;;  %v90_v23 = vsel %vm88_vm0, %v63_v15, %v79_v20  ;;  %v114_v44 = vpop.permute.xlu2 %113 }
  0x82   :  { %v94_v21 = vsel %vm93_vm1, %v89_v19, %v77_v18  ;;  %v95_v24 = vsel %vm93_vm1, %v90_v23, %v79_v20 }
  0x83   :  { %v99_v22 = vsel %vm98_vm2, %v94_v21, %v77_v18  ;;  %v100_v26 = vsel %vm98_vm2, %v95_v24, %v79_v20  ;;  %v320_v24 = vld [vmem:[%s1384_s3 + $0x20] sm:$0xff] }
  0x84   :  { %847 = vmatmul.msk.f32.vlgmr.msra.gmra.mxu0 %vm150_vm3, %v99_v22  ;;  %352 = vmatpush.msra.mxu1 %v320_v24  ;;  %v436_v24 = vld [vmem:[%s1386_s5 + $0x8] sm:$0xff] }
  0x86   :  { %353 = vmatpush.msra.mxu1 %v319_v25  ;;  %v435_v25 = vld [vmem:[%s1386_s5] sm:$0xff] }
  0x88   :  { %v83_v29 = vpop.permute.xlu1 %82  ;;  %v67_v30 = vpop.permute.xlu0 %66 }
  0x89   :  { %v92_v32 = vsel %vm88_vm0, %v67_v30, %v83_v29 }
  0x8a   :  { %v97_v33 = vsel %vm93_vm1, %v92_v32, %v83_v29 }
  0x8b   :  { %v102_v34 = vsel %vm98_vm2, %v97_v33, %v83_v29 }
  0x8c   :  { %848 = vmatmul.msk.f32.gmra.mxu0 %vm150_vm3, %v100_v26  ;;  %v318_v26 = vld [vmem:[%s1384_s3 + $0x10] sm:$0xff] }
  0x8d   :  { %354 = vmatpush.msra.mxu1 %v318_v26 }
  0x8f   :  { %355 = vmatpush.msra.mxu1 %v317_v27 }
  0x90   :  { %v124_v36 = vpop.permute.xlu0 %123  ;;  %v110_v38 = vpop.permute.xlu1 %109 }
  0x91   :  { %v139_v37 = vsel %vm98_vm2, %v108_v35, %v124_v36  ;;  %v140_v40 = vsel %vm98_vm2, %v110_v38, %v126_v39  ;;  %356 = vmatpush.msra.mxu1 %v316_v28 }
  0x94   :  { %849 = vmatmul.msk.f32.gmra.mxu0 %vm150_vm3, %v101_v31 }
  0x98   :  { %v112_v41 = vpop.permute.xlu0 %111  ;;  %v128_v42 = vpop.permute.xlu1 %127 }
  0x99   :  { %v141_v43 = vsel %vm98_vm2, %v112_v41, %v128_v42 }
  0x9c   :  { %850 = vmatmul.msk.f32.gmra.mxu0 %vm150_vm3, %v102_v34 }
  0xa0   :  { %v130_v45 = vpop.permute.xlu0 %129 }
  0xa1   :  { %v142_v46 = vsel %vm98_vm2, %v114_v44, %v130_v45 }
  0xa4   :  { %851 = vmatmul.msk.f32.gmra.mxu0 %vm150_vm3, %v139_v37 }
  0xac   :  { %852 = vmatmul.msk.f32.gmra.mxu0 %vm150_vm3, %v140_v40 }
  0xb4   :  { %853 = vmatmul.msk.f32.gmra.mxu0 %vm150_vm3, %v141_v43 }
  0xbc   :  { %854 = vmatmul.msk.f32.gmra.mxu0 %vm150_vm3, %v142_v46 }
 0x101   :  { %v192_v49 = vpop.f32.mrf.mxu0 }
 0x102   :  { %v193_v50 = vadd.f32 %v916_v48, %v192_v49 }
 0x104   :  { %v216_v51 = vmax.f32 %v193_v50, 0.0 }
 0x106   :  { %234 = vst.msk [vmem:[#allocation3] sm:$0xff] %vm229_vm5, %v216_v51 }
 0x109   :  { %v195_v52 = vpop.f32.mrf.mxu0 }
 0x10a   :  { %v196_v53 = vadd.f32 %v916_v48, %v195_v52 }
 0x10c   :  { %v217_v54 = vmax.f32 %v196_v53, 0.0 }
 0x10d   :  { %v242_v55 = vld [vmem:[#allocation3] sm:$0xff] }
 0x10e   :  { %235 = vst.msk [vmem:[#allocation3 + $0x8] sm:$0xff] %vm229_vm5, %v217_v54  ;;  %258 = vrot.lane.b32.xlu1 %v242_v55, %s953_s27 }
 0x111   :  { %v198_v56 = vpop.f32.mrf.mxu0 }
 0x112   :  { %v199_v57 = vadd.f32 %v916_v48, %v198_v56 }
 0x114   :  { %v218_v58 = vmax.f32 %v199_v57, 0.0 }
 0x115   :  { %v250_v59 = vld [vmem:[#allocation3 + $0x1] sm:$0xff]  ;;  %v251_v0 = vld [vmem:[#allocation3 + $0x9] sm:$0xff] }
 0x116   :  { %v243_v60 = vld [vmem:[#allocation3 + $0x8] sm:$0xff]  ;;  %236 = vst.msk [vmem:[#allocation3 + $0x18] sm:$0xff] %vm229_vm5, %v218_v58  ;;  %290 = vrot.lane.b32.xlu0 %v250_v59, %s954_s2  ;;  %v917_v58 = vld [vmem:[%s1385_s4] ss:$0 sm:$0xff] }
 0x117   :  { %260 = vrot.lane.b32.xlu1 %v243_v60, %s953_s27 }
 0x119   :  { %v201_v61 = vpop.f32.mrf.mxu0 }
 0x11a   :  { %v202_v62 = vadd.f32 %v916_v48, %v201_v61 }
 0x11c   :  { %v219_v63 = vmax.f32 %v202_v62, 0.0  ;;  %v446_v62 = vld [vmem:[%s1386_s5 + $0x58] sm:$0xff] }
 0x11d   :  { %v244_v1 = vld [vmem:[#allocation3 + $0x18] sm:$0xff]  ;;  %468 = vmatpush.msrb.mxu0 %v446_v62  ;;  %891 = vmatpush.msra.mxu2 %v446_v62 }
 0x11e   :  { %237 = vst.msk [vmem:[#allocation3 + $0x20] sm:$0xff] %vm229_vm5, %v219_v63  ;;  %292 = vrot.lane.b32.xlu0 %v251_v0, %s954_s2  ;;  %v445_v63 = vld [vmem:[%s1386_s5 + $0x50] sm:$0xff]  ;;  %v444_v0 = vld [vmem:[%s1386_s5 + $0x48] sm:$0xff] }
 0x11f   :  { %262 = vrot.lane.b32.xlu1 %v244_v1, %s953_s27  ;;  %469 = vmatpush.msrb.mxu0 %v445_v63 }
 0x120   :  { %892 = vmatpush.msra.mxu2 %v445_v63 }
 0x121   :  { %v204_v2 = vpop.f32.mrf.mxu0  ;;  %470 = vmatpush.msrb.mxu0 %v444_v0 }
 0x122   :  { %v205_v3 = vadd.f32 %v916_v48, %v204_v2  ;;  %893 = vmatpush.msra.mxu2 %v444_v0 }
 0x124   :  { %v220_v4 = vmax.f32 %v205_v3, 0.0  ;;  %v443_v3 = vld [vmem:[%s1386_s5 + $0x40] sm:$0xff] }
 0x125   :  { %v252_v5 = vld [vmem:[#allocation3 + $0x19] sm:$0xff]  ;;  %v253_v13 = vld [vmem:[#allocation3 + $0x21] sm:$0xff]  ;;  %471 = vmatpush.msrb.mxu0 %v443_v3  ;;  %894 = vmatpush.msra.mxu2 %v443_v3 }
 0x126   :  { %v245_v6 = vld [vmem:[#allocation3 + $0x20] sm:$0xff]  ;;  %230 = vst.msk [vmem:[#allocation2 + $0x1] sm:$0xff] %vm229_vm5, %v220_v4  ;;  %294 = vrot.lane.b32.xlu0 %v252_v5, %s954_s2  ;;  %v442_v5 = vld [vmem:[%s1386_s5 + $0x38] sm:$0xff] }
 0x127   :  { %264 = vrot.lane.b32.xlu1 %v245_v6, %s953_s27  ;;  %472 = vmatpush.msrb.mxu0 %v442_v5  ;;  %v441_v6 = vld [vmem:[%s1386_s5 + $0x30] sm:$0xff]  ;;  %v564_v3 = vld [vmem:[%s1388_s7 + $0x58] sm:$0xff] }
 0x128   :  { %895 = vmatpush.msra.mxu2 %v442_v5  ;;  %581 = vmatpush.msra.mxu3 %v564_v3  ;;  %v562_v5 = vld [vmem:[%s1388_s7 + $0x48] sm:$0xff]  ;;  %v879_v3 = vld [vmem:[%s1388_s7 + $0xa0] sm:$0xff] }
 0x129   :  { %v207_v10 = vpop.f32.mrf.mxu0  ;;  %473 = vmatpush.msrb.mxu0 %v441_v6 }
 0x12a   :  { %v208_v11 = vadd.f32 %v916_v48, %v207_v10  ;;  %896 = vmatpush.msra.mxu2 %v441_v6  ;;  %v561_v6 = vld [vmem:[%s1388_s7 + $0x40] sm:$0xff] }
 0x12c   :  { %v221_v12 = vmax.f32 %v208_v11, 0.0 }
 0x12d   :  { %v246_v14 = vld [vmem:[#allocation2 + $0x1] sm:$0xff] }
 0x12e   :  { %231 = vst.msk [vmem:[#allocation2 + $0x9] sm:$0xff] %vm229_vm5, %v221_v12  ;;  %296 = vrot.lane.b32.xlu0 %v253_v13, %s954_s2  ;;  %274 = vrot.lane.b32.xlu2 %v246_v14, %s955_s13  ;;  %v238_v30 = vld [vmem:[#allocation2] sm:$0xff] }
 0x131   :  { %v210_v15 = vpop.f32.mrf.mxu0 }
 0x132   :  { %v211_v16 = vadd.f32 %v916_v48, %v210_v15 }
 0x134   :  { %v222_v17 = vmax.f32 %v211_v16, 0.0 }
 0x135   :  { %v247_v18 = vld [vmem:[#allocation2 + $0x9] sm:$0xff] }
 0x136   :  { %232 = vst.msk [vmem:[#allocation2 + $0x19] sm:$0xff] %vm229_vm5, %v222_v17  ;;  %276 = vrot.lane.b32.xlu2 %v247_v18, %s955_s13  ;;  %v239_v37 = vld [vmem:[#allocation2 + $0x8] sm:$0xff] }
 0x139   :  { %v213_v19 = vpop.f32.mrf.mxu0 }
 0x13a   :  { %v214_v20 = vadd.f32 %v916_v48, %v213_v19 }
 0x13c   :  { %v223_v21 = vmax.f32 %v214_v20, 0.0  ;;  %v440_v20 = vld [vmem:[%s1386_s5 + $0x28] sm:$0xff] }
 0x13d   :  { %v248_v22 = vld [vmem:[#allocation2 + $0x19] sm:$0xff]  ;;  %474 = vmatpush.msrb.mxu0 %v440_v20  ;;  %897 = vmatpush.msra.mxu2 %v440_v20 }
 0x13e   :  { %233 = vst.msk [vmem:[#allocation2 + $0x21] sm:$0xff] %vm229_vm5, %v223_v21  ;;  %278 = vrot.lane.b32.xlu2 %v248_v22, %s955_s13  ;;  %v240_v44 = vld [vmem:[#allocation2 + $0x18] sm:$0xff]  ;;  %v439_v21 = vld [vmem:[%s1386_s5 + $0x20] sm:$0xff] }
 0x13f   :  { %475 = vmatpush.msrb.mxu0 %v439_v21  ;;  %898 = vmatpush.msra.mxu2 %v439_v21  ;;  %v438_v22 = vld [vmem:[%s1386_s5 + $0x18] sm:$0xff] }
 0x141   :  { %476 = vmatpush.msrb.mxu0 %v438_v22  ;;  %899 = vmatpush.msra.mxu2 %v438_v22 }
 0x145   :  { %v249_v23 = vld [vmem:[#allocation2 + $0x21] sm:$0xff] }
 0x146   :  { %280 = vrot.lane.b32.xlu2 %v249_v23, %s955_s13  ;;  %v241_v52 = vld [vmem:[#allocation2 + $0x20] sm:$0xff]  ;;  %v437_v23 = vld [vmem:[%s1386_s5 + $0x10] sm:$0xff] }
 0x147   :  { %477 = vmatpush.msrb.mxu0 %v437_v23  ;;  %900 = vmatpush.msra.mxu2 %v437_v23 }
 0x149   :  { %478 = vmatpush.msrb.mxu0 %v436_v24  ;;  %901 = vmatpush.msra.mxu2 %v436_v24 }
 0x14b   :  { %902 = vmatpush.msra.mxu2 %v435_v25  ;;  %479 = vmatpush.msrb.mxu0 %v435_v25 }
 0x180   :  { %v259_v29 = vpop.permute.xlu1 %258 }
 0x181   :  { %v302_v31 = vsel %vm229_vm5, %v238_v30, %v259_v29 }
 0x188   :  { %v275_v32 = vpop.permute.xlu2 %274  ;;  %v291_v35 = vpop.permute.xlu0 %290 }
 0x189   :  { %v261_v33 = vpop.permute.xlu1 %260  ;;  %v307_v34 = vsel %vm306_vm6, %v302_v31, %v275_v32 }
 0x18a   :  { %v312_v36 = vsel %vm311_vm7, %v307_v34, %v291_v35  ;;  %v303_v38 = vsel %vm229_vm5, %v239_v37, %v261_v33 }
 0x18b   :  { %855 = vmatmul.msk.f32.vlgmr.msra.gmra.mxu1 %vm328_vm8, %v312_v36 }
 0x190   :  { %v277_v39 = vpop.permute.xlu2 %276  ;;  %v293_v41 = vpop.permute.xlu0 %292 }
 0x191   :  { %v308_v40 = vsel %vm306_vm6, %v303_v38, %v277_v39  ;;  %v263_v43 = vpop.permute.xlu1 %262 }
 0x192   :  { %v313_v42 = vsel %vm311_vm7, %v308_v40, %v293_v41  ;;  %v304_v45 = vsel %vm229_vm5, %v240_v44, %v263_v43 }
 0x193   :  { %856 = vmatmul.msk.f32.gmra.mxu1 %vm328_vm8, %v313_v42 }
 0x198   :  { %v279_v46 = vpop.permute.xlu2 %278  ;;  %v295_v49 = vpop.permute.xlu0 %294 }
 0x199   :  { %v309_v48 = vsel %vm306_vm6, %v304_v45, %v279_v46  ;;  %v265_v51 = vpop.permute.xlu1 %264  ;;  %v918_v46 = vld [vmem:[%s1387_s6] ss:$0 sm:$0xff] }
 0x19a   :  { %v314_v50 = vsel %vm311_vm7, %v309_v48, %v295_v49  ;;  %v305_v53 = vsel %vm229_vm5, %v241_v52, %v265_v51 }
 0x19b   :  { %857 = vmatmul.msk.f32.gmra.mxu1 %vm328_vm8, %v314_v50 }
 0x1a0   :  { %v281_v54 = vpop.permute.xlu2 %280  ;;  %v297_v56 = vpop.permute.xlu0 %296 }
 0x1a1   :  { %v310_v55 = vsel %vm306_vm6, %v305_v53, %v281_v54 }
 0x1a2   :  { %v315_v57 = vsel %vm311_vm7, %v310_v55, %v297_v56 }
 0x1a3   :  { %858 = vmatmul.msk.f32.gmra.mxu1 %vm328_vm8, %v315_v57 }
 0x208   :  { %v358_v59 = vpop.f32.mrf.mxu1 }
 0x209   :  { %v359_v60 = vadd.f32 %v917_v58, %v358_v59 }
 0x20b   :  { %v370_v61 = vmax.f32 %v359_v60, 0.0 }
 0x20d   :  { %379 = vst.msk [vmem:[#allocation4 + $0x1] sm:$0xff] %vm306_vm6, %v370_v61 }
 0x210   :  { %v361_v47 = vpop.f32.mrf.mxu1 }
 0x211   :  { %v362_v1 = vadd.f32 %v917_v58, %v361_v47 }
 0x213   :  { %v371_v2 = vmax.f32 %v362_v1, 0.0 }
 0x214   :  { %v387_v4 = vld [vmem:[#allocation4 + $0x1] sm:$0xff] }
 0x215   :  { %380 = vst.msk [vmem:[#allocation4 + $0x9] sm:$0xff] %vm306_vm6, %v371_v2  ;;  %399 = vrot.lane.b32.xlu0 %v387_v4, %s955_s13  ;;  %v383_v32 = vld [vmem:[#allocation4] sm:$0xff]  ;;  %v563_v4 = vld [vmem:[%s1388_s7 + $0x50] sm:$0xff] }
 0x216   :  { %582 = vmatpush.msra.mxu3 %v563_v4  ;;  %v878_v4 = vld [vmem:[%s1388_s7 + $0x98] sm:$0xff] }
 0x218   :  { %v364_v7 = vpop.f32.mrf.mxu1  ;;  %583 = vmatpush.msra.mxu3 %v562_v5  ;;  %v877_v5 = vld [vmem:[%s1388_s7 + $0x90] sm:$0xff] }
 0x219   :  { %v365_v8 = vadd.f32 %v917_v58, %v364_v7  ;;  %v560_v7 = vld [vmem:[%s1388_s7 + $0x38] sm:$0xff] }
 0x21a   :  { %584 = vmatpush.msra.mxu3 %v561_v6  ;;  %v876_v6 = vld [vmem:[%s1388_s7 + $0x88] sm:$0xff] }
 0x21b   :  { %v372_v9 = vmax.f32 %v365_v8, 0.0  ;;  %v559_v8 = vld [vmem:[%s1388_s7 + $0x30] sm:$0xff] }
 0x21c   :  { %v392_v10 = vld [vmem:[#allocation4 + $0xa] sm:$0xff]  ;;  %v391_v15 = vld [vmem:[#allocation4 + $0x2] sm:$0xff]  ;;  %585 = vmatpush.msra.mxu3 %v560_v7 }
 0x21d   :  { %v388_v11 = vld [vmem:[#allocation4 + $0x9] sm:$0xff]  ;;  %381 = vst.msk [vmem:[#allocation4 + $0x19] sm:$0xff] %vm306_vm6, %v372_v9  ;;  %417 = vrot.lane.b32.xlu2 %v392_v10, %s956_s11  ;;  %v557_v10 = vld [vmem:[%s1388_s7 + $0x20] sm:$0xff] }
 0x21e   :  { %401 = vrot.lane.b32.xlu1 %v388_v11, %s955_s13  ;;  %v384_v27 = vld [vmem:[#allocation4 + $0x8] sm:$0xff]  ;;  %586 = vmatpush.msra.mxu3 %v559_v8  ;;  %v556_v11 = vld [vmem:[%s1388_s7 + $0x18] sm:$0xff]  ;;  %v875_v7 = vld [vmem:[%s1388_s7 + $0x80] sm:$0xff] }
 0x21f   :  { %v558_v9 = vld [vmem:[%s1388_s7 + $0x28] sm:$0xff]  ;;  %v874_v8 = vld [vmem:[%s1388_s7 + $0x78] sm:$0xff] }
 0x220   :  { %v367_v12 = vpop.f32.mrf.mxu1  ;;  %587 = vmatpush.msra.mxu3 %v558_v9  ;;  %v873_v9 = vld [vmem:[%s1388_s7 + $0x70] sm:$0xff] }
 0x221   :  { %v368_v13 = vadd.f32 %v917_v58, %v367_v12  ;;  %v555_v12 = vld [vmem:[%s1388_s7 + $0x10] sm:$0xff] }
 0x222   :  { %588 = vmatpush.msra.mxu3 %v557_v10  ;;  %v872_v10 = vld [vmem:[%s1388_s7 + $0x68] sm:$0xff] }
 0x223   :  { %v373_v14 = vmax.f32 %v368_v13, 0.0  ;;  %v554_v13 = vld [vmem:[%s1388_s7 + $0x8] sm:$0xff] }
 0x224   :  { %v389_v16 = vld [vmem:[#allocation4 + $0x19] sm:$0xff]  ;;  %589 = vmatpush.msra.mxu3 %v556_v11 }
 0x225   :  { %382 = vst.msk [vmem:[#allocation4 + $0x21] sm:$0xff] %vm306_vm6, %v373_v14  ;;  %403 = vrot.lane.b32.xlu2 %v389_v16, %s955_s13  ;;  %v385_v37 = vld [vmem:[#allocation4 + $0x18] sm:$0xff]  ;;  %v553_v14 = vld [vmem:[%s1388_s7] sm:$0xff] }
 0x226   :  { %415 = vrot.lane.b32.xlu1 %v391_v15, %s956_s11  ;;  %590 = vmatpush.msra.mxu3 %v555_v12  ;;  %v610_v15 = vld [vmem:[#allocation5] sm:$0xff]  ;;  %v871_v11 = vld [vmem:[%s1388_s7 + $0x60] sm:$0xff]  ;;  %v776_v12 = vld [vmem:[#allocation5 + $0x8] sm:$0xff] }
 0x227   :  { %639 = vmatpush.msrb.mxu1 %v610_v15 }
 0x228   :  { %591 = vmatpush.msra.mxu3 %v554_v13 }
 0x22a   :  { %592 = vmatpush.msra.mxu3 %v553_v14 }
 0x22c   :  { %v394_v17 = vld [vmem:[#allocation4 + $0x22] sm:$0xff]  ;;  %v393_v18 = vld [vmem:[#allocation4 + $0x1a] sm:$0xff]  ;;  %804 = vmatpush.msrb.mxu3 %v776_v12 }
 0x22d   :  { %v390_v19 = vld [vmem:[#allocation4 + $0x21] sm:$0xff]  ;;  %421 = vrot.lane.b32.xlu2 %v394_v17, %s956_s11  ;;  %419 = vrot.lane.b32.xlu0 %v393_v18, %s956_s11 }
 0x22e   :  { %405 = vrot.lane.b32.xlu1 %v390_v19, %s955_s13  ;;  %v386_v42 = vld [vmem:[#allocation4 + $0x20] sm:$0xff] }
 0x277   :  { %v418_v28 = vpop.permute.xlu2 %417 }
 0x27f   :  { %v404_v36 = vpop.permute.xlu2 %403 }
 0x280   :  { %v429_v38 = vsel %vm306_vm6, %v385_v37, %v404_v36 }
 0x287   :  { %v400_v31 = vpop.permute.xlu0 %399  ;;  %v422_v44 = vpop.permute.xlu2 %421 }
 0x288   :  { %v427_v33 = vsel %vm306_vm6, %v383_v32, %v400_v31 }
 0x290   :  { %v402_v26 = vpop.permute.xlu1 %401 }
 0x291   :  { %v428_v29 = vsel %vm306_vm6, %v384_v27, %v402_v26 }
 0x292   :  { %v432_v30 = vsel %vm328_vm8, %v428_v29, %v418_v28 }
 0x293   :  { %860 = vmatmul.msk.f32.vlgmr.msra.gmra.mxu2 %vm451_vm10, %v432_v30 }
 0x298   :  { %v416_v34 = vpop.permute.xlu1 %415 }
 0x299   :  { %v431_v35 = vsel %vm328_vm8, %v427_v33, %v416_v34 }
 0x29a   :  { %859 = vmatmul.msk.f32.vlgmr.msrb.gmra.mxu0 %vm451_vm10, %v431_v35 }
 0x29f   :  { %v420_v39 = vpop.permute.xlu0 %419 }
 0x2a0   :  { %v433_v40 = vsel %vm328_vm8, %v429_v38, %v420_v39  ;;  %v406_v41 = vpop.permute.xlu1 %405 }
 0x2a1   :  { %861 = vmatmul.msk.f32.gmra.mxu2 %vm451_vm10, %v433_v40  ;;  %v430_v43 = vsel %vm306_vm6, %v386_v42, %v406_v41 }
 0x2a2   :  { %v434_v45 = vsel %vm328_vm8, %v430_v43, %v422_v44 }
 0x2a9   :  { %862 = vmatmul.msk.f32.gmra.mxu2 %vm451_vm10, %v434_v45 }
 0x316   :  { %v484_v48 = vpop.f32.mrf.mxu2 }
 0x317   :  { %v1213_v49 = vadd.f32 %v918_v46, %v484_v48  ;;  %v481_v50 = vpop.f32.mrf.mxu0 }
 0x318   :  { %v1215_v51 = vadd.f32 %v918_v46, %v481_v50 }
 0x319   :  { %v494_v52 = vmax.f32 %v1213_v49, 0.0 }
 0x31a   :  { %v493_v53 = vmax.f32 %v1215_v51, 0.0 }
 0x31b   :  { %498 = vst.msk [vmem:[#allocation4 + $0x9] sm:$0xff] %vm306_vm6, %v494_v52 }
 0x31c   :  { %497 = vst.msk [vmem:[#allocation4 + $0x1] sm:$0xff] %vm306_vm6, %v493_v53 }
 0x322   :  { %v506_v54 = vld [vmem:[#allocation4 + $0x9] sm:$0xff] }
 0x323   :  { %519 = vrot.lane.b32.xlu2 %v506_v54, %s955_s13  ;;  %v509_v55 = vld [vmem:[#allocation4 + $0x2] sm:$0xff]  ;;  %v510_v60 = vld [vmem:[#allocation4 + $0xa] sm:$0xff] }
 0x324   :  { %v505_v56 = vld [vmem:[#allocation4 + $0x1] sm:$0xff]  ;;  %533 = vrot.lane.b32.xlu1 %v509_v55, %s956_s11  ;;  %v487_v57 = vpop.f32.mrf.mxu2 }
 0x325   :  { %517 = vrot.lane.b32.xlu0 %v505_v56, %s955_s13  ;;  %v1224_v58 = vadd.f32 %v918_v46, %v487_v57  ;;  %v501_v17 = vld [vmem:[#allocation4] sm:$0xff]  ;;  %v502_v22 = vld [vmem:[#allocation4 + $0x8] sm:$0xff] }
 0x327   :  { %v495_v59 = vmax.f32 %v1224_v58, 0.0 }
 0x329   :  { %499 = vst.msk [vmem:[#allocation4 + $0x19] sm:$0xff] %vm306_vm6, %v495_v59 }
 0x32c   :  { %v490_v61 = vpop.f32.mrf.mxu2 }
 0x32d   :  { %535 = vrot.lane.b32.xlu0 %v510_v60, %s956_s11  ;;  %v1229_v62 = vadd.f32 %v918_v46, %v490_v61 }
 0x32f   :  { %v496_v63 = vmax.f32 %v1229_v62, 0.0 }
 0x330   :  { %v507_v47 = vld [vmem:[#allocation4 + $0x19] sm:$0xff] }
 0x331   :  { %500 = vst.msk [vmem:[#allocation4 + $0x21] sm:$0xff] %vm306_vm6, %v496_v63  ;;  %521 = vrot.lane.b32.xlu1 %v507_v47, %s955_s13  ;;  %v503_v27 = vld [vmem:[#allocation4 + $0x18] sm:$0xff] }
 0x338   :  { %v508_v0 = vld [vmem:[#allocation4 + $0x21] sm:$0xff] }
 0x339   :  { %v511_v1 = vld [vmem:[#allocation4 + $0x1a] sm:$0xff]  ;;  %v512_v2 = vld [vmem:[#allocation4 + $0x22] sm:$0xff]  ;;  %523 = vrot.lane.b32.xlu0 %v508_v0, %s955_s13 }
 0x33a   :  { %537 = vrot.lane.b32.xlu2 %v511_v1, %s956_s11  ;;  %539 = vrot.lane.b32.xlu1 %v512_v2, %s956_s11  ;;  %v504_v31 = vld [vmem:[#allocation4 + $0x20] sm:$0xff]  ;;  %v881_v1 = vld [vmem:[%s1388_s7 + $0xb0] sm:$0xff]  ;;  %v880_v2 = vld [vmem:[%s1388_s7 + $0xa8] sm:$0xff] }
 0x37d   :  { %v520_v21 = vpop.permute.xlu2 %519 }
 0x37e   :  { %v546_v23 = vsel %vm306_vm6, %v502_v22, %v520_v21 }
 0x394   :  { %v538_v29 = vpop.permute.xlu2 %537 }
 0x396   :  { %v534_v16 = vpop.permute.xlu1 %533 }
 0x397   :  { %v518_v18 = vpop.permute.xlu0 %517 }
 0x398   :  { %v545_v19 = vsel %vm306_vm6, %v501_v17, %v518_v18 }
 0x399   :  { %v549_v20 = vsel %vm328_vm8, %v545_v19, %v534_v16 }
 0x39a   :  { %863 = vmatmul.msk.f32.vlgmr.msra.gmra.mxu3 %vm451_vm10, %v549_v20 }
 0x39f   :  { %v536_v24 = vpop.permute.xlu0 %535 }
 0x3a0   :  { %v550_v25 = vsel %vm328_vm8, %v546_v23, %v536_v24 }
 0x3a2   :  { %864 = vmatmul.msk.f32.gmra.mxu3 %vm451_vm10, %v550_v25 }
 0x3a3   :  { %v522_v26 = vpop.permute.xlu1 %521 }
 0x3a4   :  { %v547_v28 = vsel %vm306_vm6, %v503_v27, %v522_v26 }
 0x3a5   :  { %v551_v30 = vsel %vm328_vm8, %v547_v28, %v538_v29 }
 0x3aa   :  { %865 = vmatmul.msk.f32.gmra.mxu3 %vm451_vm10, %v551_v30 }
 0x3ab   :  { %v524_v32 = vpop.permute.xlu0 %523 }
 0x3ac   :  { %v540_v33 = vpop.permute.xlu1 %539  ;;  %v548_v34 = vsel %vm306_vm6, %v504_v31, %v524_v32 }
 0x3ad   :  { %v552_v35 = vsel %vm328_vm8, %v548_v34, %v540_v33 }
 0x3b2   :  { %866 = vmatmul.msk.f32.gmra.mxu3 %vm451_vm10, %v552_v35 }
 0x41d   :  { %v594_v36 = vpop.f32.mrf.mxu3 }
 0x41e   :  { %v606_v37 = vmax.f32 %v594_v36, 0.0 }
 0x420   :  { %867 = vmatmul.msk.f32.vlgmr.msrb.gmra.mxu1 %vm611_vm11, %v606_v37 }
 0x425   :  { %v597_v38 = vpop.f32.mrf.mxu3 }
 0x426   :  { %v607_v39 = vmax.f32 %v597_v38, 0.0 }
 0x428   :  { %868 = vmatmul.msk.f32.gmra.mxu1 %vm611_vm11, %v607_v39 }
 0x42d   :  { %v600_v40 = vpop.f32.mrf.mxu3 }
 0x42e   :  { %v608_v41 = vmax.f32 %v600_v40, 0.0 }
 0x430   :  { %869 = vmatmul.msk.f32.gmra.mxu1 %vm611_vm11, %v608_v41 }
 0x435   :  { %v603_v42 = vpop.f32.mrf.mxu3 }
 0x436   :  { %v609_v43 = vmax.f32 %v603_v42, 0.0 }
 0x438   :  { %870 = vmatmul.msk.f32.gmra.mxu1 %vm611_vm11, %v609_v43 }
 0x49d   :  { %v641_v44 = vpop.f32.mrf.mxu1 }
 0x49e   :  { %v1290_v45 = vadd.f32 %v641_v44, %v1215_v51 }
 0x4a0   :  { %v657_v46 = vmax.f32 %v1290_v45, 0.0 }
 0x4a2   :  { %661 = vst.msk [vmem:[#allocation4 + $0x1] sm:$0xff] %vm306_vm6, %v657_v46 }
 0x4a5   :  { %v644_v48 = vpop.f32.mrf.mxu1 }
 0x4a6   :  { %v1295_v50 = vadd.f32 %v644_v48, %v1213_v49 }
 0x4a8   :  { %v658_v52 = vmax.f32 %v1295_v50, 0.0 }
 0x4a9   :  { %v669_v53 = vld [vmem:[#allocation4 + $0x1] sm:$0xff] }
 0x4aa   :  { %662 = vst.msk [vmem:[#allocation4 + $0x9] sm:$0xff] %vm306_vm6, %v658_v52  ;;  %681 = vrot.lane.b32.xlu2 %v669_v53, %s955_s13  ;;  %v665_v14 = vld [vmem:[#allocation4] sm:$0xff] }
 0x4ad   :  { %v647_v54 = vpop.f32.mrf.mxu1 }
 0x4ae   :  { %v1301_v55 = vadd.f32 %v647_v54, %v1224_v58 }
 0x4b0   :  { %v659_v51 = vmax.f32 %v1301_v55, 0.0 }
 0x4b1   :  { %v674_v56 = vld [vmem:[#allocation4 + $0xa] sm:$0xff]  ;;  %v673_v57 = vld [vmem:[#allocation4 + $0x2] sm:$0xff] }
 0x4b2   :  { %v670_v59 = vld [vmem:[#allocation4 + $0x9] sm:$0xff]  ;;  %663 = vst.msk [vmem:[#allocation4 + $0x19] sm:$0xff] %vm306_vm6, %v659_v51  ;;  %699 = vrot.lane.b32.xlu2 %v674_v56, %s956_s11  ;;  %697 = vrot.lane.b32.xlu0 %v673_v57, %s956_s11 }
 0x4b3   :  { %683 = vrot.lane.b32.xlu1 %v670_v59, %s955_s13  ;;  %v666_v19 = vld [vmem:[#allocation4 + $0x8] sm:$0xff] }
 0x4b5   :  { %v650_v49 = vpop.f32.mrf.mxu1 }
 0x4b6   :  { %v1309_v60 = vadd.f32 %v650_v49, %v1229_v62  ;;  %v882_v62 = vld [vmem:[%s1388_s7 + $0xb8] sm:$0xff]  ;;  %s957_s7 = smov 96  }
 0x4b7   :  { %746 = vmatpush.msrb.mxu2 %v882_v62 }
 0x4b8   :  { %v660_v58 = vmax.f32 %v1309_v60, 0.0 }
 0x4b9   :  { %v671_v61 = vld [vmem:[#allocation4 + $0x19] sm:$0xff]  ;;  %747 = vmatpush.msrb.mxu2 %v881_v1 }
 0x4ba   :  { %664 = vst.msk [vmem:[#allocation4 + $0x21] sm:$0xff] %vm306_vm6, %v660_v58  ;;  %685 = vrot.lane.b32.xlu0 %v671_v61, %s955_s13  ;;  %v667_v24 = vld [vmem:[#allocation4 + $0x18] sm:$0xff] }
 0x4bb   :  { %748 = vmatpush.msrb.mxu2 %v880_v2 }
 0x4bd   :  { %749 = vmatpush.msrb.mxu2 %v879_v3 }
 0x4bf   :  { %750 = vmatpush.msrb.mxu2 %v878_v4 }
 0x4c1   :  { %v676_v63 = vld [vmem:[#allocation4 + $0x22] sm:$0xff]  ;;  %v675_v47 = vld [vmem:[#allocation4 + $0x1a] sm:$0xff]  ;;  %751 = vmatpush.msrb.mxu2 %v877_v5 }
 0x4c2   :  { %v672_v0 = vld [vmem:[#allocation4 + $0x21] sm:$0xff]  ;;  %703 = vrot.lane.b32.xlu0 %v676_v63, %s956_s11  ;;  %701 = vrot.lane.b32.xlu1 %v675_v47, %s956_s11 }
 0x4c3   :  { %687 = vrot.lane.b32.xlu2 %v672_v0, %s955_s13  ;;  %752 = vmatpush.msrb.mxu2 %v876_v6  ;;  %v668_v30 = vld [vmem:[#allocation4 + $0x20] sm:$0xff] }
 0x4c5   :  { %753 = vmatpush.msrb.mxu2 %v875_v7 }
 0x4c7   :  { %754 = vmatpush.msrb.mxu2 %v874_v8 }
 0x4c9   :  { %755 = vmatpush.msrb.mxu2 %v873_v9 }
 0x4cb   :  { %756 = vmatpush.msrb.mxu2 %v872_v10 }
 0x4cd   :  { %757 = vmatpush.msrb.mxu2 %v871_v11 }
 0x504   :  { %v682_v13 = vpop.permute.xlu2 %681 }
 0x505   :  { %v709_v15 = vsel %vm306_vm6, %v665_v14, %v682_v13 }
 0x50c   :  { %v700_v21 = vpop.permute.xlu2 %699 }
 0x51d   :  { %v688_v28 = vpop.permute.xlu2 %687 }
 0x51e   :  { %v712_v31 = vsel %vm306_vm6, %v668_v30, %v688_v28 }
 0x524   :  { %v698_v16 = vpop.permute.xlu0 %697 }
 0x525   :  { %v713_v17 = vsel %vm328_vm8, %v709_v15, %v698_v16  ;;  %v684_v18 = vpop.permute.xlu1 %683 }
 0x526   :  { %883 = vmatmul.msk.f32.vlgmr.msrb.gmra.mxu2 %vm451_vm10, %v713_v17  ;;  %v710_v20 = vsel %vm306_vm6, %v666_v19, %v684_v18 }
 0x527   :  { %v714_v22 = vsel %vm328_vm8, %v710_v20, %v700_v21 }
 0x52c   :  { %v686_v23 = vpop.permute.xlu0 %685 }
 0x52d   :  { %v711_v25 = vsel %vm306_vm6, %v667_v24, %v686_v23 }
 0x52e   :  { %884 = vmatmul.msk.f32.gmra.mxu2 %vm451_vm10, %v714_v22 }
 0x534   :  { %v702_v26 = vpop.permute.xlu1 %701  ;;  %v704_v29 = vpop.permute.xlu0 %703 }
 0x535   :  { %v715_v27 = vsel %vm328_vm8, %v711_v25, %v702_v26  ;;  %v716_v32 = vsel %vm328_vm8, %v712_v31, %v704_v29 }
 0x536   :  { %885 = vmatmul.msk.f32.gmra.mxu2 %vm451_vm10, %v715_v27 }
 0x53e   :  { %886 = vmatmul.msk.f32.gmra.mxu2 %vm451_vm10, %v716_v32 }
 0x5a9   :  { %v759_v33 = vpop.f32.mrf.mxu2 }
 0x5aa   :  { %v771_v34 = vmax.f32 %v759_v33, 0.0 }
 0x5ac   :  { %887 = vmatmul.msk.f32.vlgmr.msrb.gmra.mxu3 %vm611_vm11, %v771_v34 }
 0x5b1   :  { %v762_v35 = vpop.f32.mrf.mxu2 }
 0x5b2   :  { %v772_v36 = vmax.f32 %v762_v35, 0.0 }
 0x5b4   :  { %888 = vmatmul.msk.f32.gmra.mxu3 %vm611_vm11, %v772_v36 }
 0x5b9   :  { %v765_v37 = vpop.f32.mrf.mxu2 }
 0x5ba   :  { %v773_v38 = vmax.f32 %v765_v37, 0.0 }
 0x5bc   :  { %889 = vmatmul.msk.f32.gmra.mxu3 %vm611_vm11, %v773_v38 }
 0x5c1   :  { %v768_v39 = vpop.f32.mrf.mxu2 }
 0x5c2   :  { %v774_v40 = vmax.f32 %v768_v39, 0.0 }
 0x5c4   :  { %890 = vmatmul.msk.f32.gmra.mxu3 %vm611_vm11, %v774_v40 }
 0x62f   :  { %v806_v41 = vpop.f32.mrf.mxu3 }
 0x630   :  { %v818_v56 = vadd.f32 %v806_v41, %v1290_v45 }
 0x632   :  { %v822_v59 = vmax.f32 %v818_v56, 0.0 }
 0x637   :  { %v809_v42 = vpop.f32.mrf.mxu3 }
 0x638   :  { %v819_v43 = vadd.f32 %v809_v42, %v1295_v50 }
 0x63a   :  { %v823_v44 = vmax.f32 %v819_v43, 0.0 }
 0x63c   :  { %827 = vrot.lane.b32.xlu1 %v823_v44, %s955_s13 }
 0x63f   :  { %v812_v46 = vpop.f32.mrf.mxu3 }
 0x640   :  { %v820_v48 = vadd.f32 %v812_v46, %v1301_v55 }
 0x642   :  { %v824_v52 = vmax.f32 %v820_v48, 0.0 }
 0x644   :  { %831 = vrot.lane.b32.xlu2 %v824_v52, %s956_s11 }
 0x647   :  { %v815_v53 = vpop.f32.mrf.mxu3 }
 0x648   :  { %v821_v54 = vadd.f32 %v815_v53, %v1309_v60 }
 0x64a   :  { %v825_v51 = vmax.f32 %v821_v54, 0.0 }
 0x64c   :  { %835 = vrot.lane.b32.xlu0 %v825_v51, %s957_s7 }
 0x69e   :  { %v832_v49 = vpop.permute.xlu2 %831 }
 0x6ae   :  { %v828_v57 = vpop.permute.xlu1 %827 }
 0x6af   :  { %v838_v50 = vsel %vm306_vm6, %v822_v59, %v828_v57 }
 0x6b0   :  { %v839_v58 = vsel %vm328_vm8, %v838_v50, %v832_v49 }
 0x6be   :  { %v836_v61 = vpop.permute.xlu0 %835 }
 0x6bf   :  { %v840_v55 = vsel %vm451_vm10, %v839_v58, %v836_v61 }
 0x6c0   :  { %841 = vst [vmem:[%s1390_s9] sm:$0xff] %v840_v55 }
 0x6c1   :  { %846 = vsyncpa [#allocation6], 1 }

</bundles_post_ra>
